<compile_context>
chip_gen: v7x
topology: tpu7x:2x2x1
jax: 0.10.0
libtpu: 0.0.40
codegen_flags: <defaults>
</compile_context>

<pallas_src>
import jax
import jax.numpy as jnp
import numpy as np
from jax.experimental import pallas as pl
from jax.experimental.pallas import tpu as pltpu

# ---- problem sizes (small, consistent with the module) ----
B = 2             # batch
L = 16            # max_len
E = 32            # emb_size
F = 8             # num_features
C = 4             # num_classes
WINDOW_SIZES = (1, 2, 3, 4, 5)
VOCAB = 50
VOCAB_PAD = 128   # padded vocab rows (zero rows never selected)
NLANE = 128       # padded lane width of the fused conv weight / feature slab
BN_EPS = 1e-5

# column offset of each window's block inside the 128-lane slab: [0, 8, 24, 48, 80]
OFFSETS = []
_c = 0
for _k in WINDOW_SIZES:
    OFFSETS.append(_c)
    _c += _k * F          # total used lanes = 120, lanes 120..127 are zero pad


def toxic_kernel(ids_ref, emb_ref, wall_ref, bias_ref, tmask_ref,
                 fcw_ref, fcb_ref, out_ref):
    """Fused gather + all-tap conv matmul + BN/ReLU/maxpool + linear, all in VMEM."""
    # ---- in-kernel embedding gather via one-hot matmul (exact) ----
    ids = ids_ref[...]                                                   # (B*L, 1) int32
    vocab_iota = jax.lax.broadcasted_iota(jnp.int32, (B * L, VOCAB_PAD), 1)
    onehot = (vocab_iota == ids).astype(jnp.float32)                     # (B*L, 128)
    x = jnp.dot(onehot, emb_ref[...], preferred_element_type=jnp.float32)   # (B*L, E)

    # ---- all conv taps (BN scale folded into weights) in ONE lane-dense matmul ----
    p = jnp.dot(x, wall_ref[...], preferred_element_type=jnp.float32)    # (B*L, 128)

    # ---- accumulate tap-j contributions into each window's tap-0 lane block ----
    lane = jax.lax.broadcasted_iota(jnp.int32, (1, NLANE), 1)
    acc = p                                                              # tap-0 already in place
    for j in range(1, max(WINDOW_SIZES)):
        # sh[r, c] = p[r + j, c + j*F]  (zero outside range): tap-j value aligned to tap-0 lanes
        sh = jnp.concatenate([p[j:, :], jnp.zeros((j, NLANE), jnp.float32)], axis=0)
        sh = jnp.concatenate([sh[:, j * F:], jnp.zeros((B * L, j * F), jnp.float32)], axis=1)
        # only windows with kernel size > j (lane offset >= OFFSETS[j]) take this tap
        mask = (lane >= OFFSETS[j]).astype(jnp.float32)
        acc = acc + sh * mask

    # ---- folded bias + ReLU, mask invalid time steps, temporal max -> (B, 128) slab ----
    y = jnp.maximum(acc + bias_ref[...], 0.0) * tmask_ref[...]           # (B*L, 128)
    h = jnp.max(y.reshape(B, L, NLANE), axis=1)                          # (B, 128)

    # ---- final linear on the lane-dense slab (padded weights) ----
    out_ref[...] = (jnp.dot(h, fcw_ref[...], preferred_element_type=jnp.float32)
                    + fcb_ref[...])                                      # (B, 128)


def toxic_forward(ids2d, emb_pad, w_all, bias_slab, tmask, fcw_pad, fcb_pad):
    """All operands are small and VMEM-resident; gridless single-shot kernel."""
    vmem = pl.BlockSpec(memory_space=pltpu.MemorySpace.VMEM)
    out = pl.pallas_call(
        toxic_kernel,
        out_shape=jax.ShapeDtypeStruct((B, NLANE), jnp.float32),
        in_specs=[vmem] * 7,
        out_specs=vmem,
    )(ids2d, emb_pad, w_all, bias_slab, tmask, fcw_pad, fcb_pad)
    return out[:, :C]


def reference_forward(x_ids, emb_table, conv_params, fc_w, fc_b):
    """Plain-JAX reference mirroring the PyTorch forward (eval mode), unfused params."""
    emb = jnp.take(emb_table, x_ids, axis=0)                             # (B, L, E)
    feats = []
    for (w, cb, gamma, beta, mean, var), k in zip(conv_params, WINDOW_SIZES):
        T = L - k + 1
        acc = jnp.zeros((B, T, F), jnp.float32)
        for j in range(k):
            acc = acc + jnp.einsum('ble,ef->blf', emb[:, j:j + T, :], w[:, :, j].T)
        acc = acc + cb[None, None, :]
        y = (acc - mean) / jnp.sqrt(var + BN_EPS) * gamma + beta          # BN eval
        y = jnp.maximum(y, 0.0)
        feats.append(jnp.max(y, axis=1))                                  # max-pool over T
    h = jnp.concatenate(feats, axis=-1)                                   # (B, 5F)
    return h @ fc_w + fc_b


if __name__ == "__main__":
    keys = iter(jax.random.split(jax.random.PRNGKey(0), 40))              # 34 needed

    # ---- synthetic "Navec"-style embedding table (no checkpoint load) ----
    emb_table = jax.random.normal(next(keys), (VOCAB, E), jnp.float32) * 0.1
    # ---- token ids (the module's forward input) ----
    x_ids = jax.random.randint(next(keys), (B, L), 0, VOCAB, dtype=jnp.int32)

    # ---- original (torch-layout) conv/BN/fc parameters ----
    conv_params = []
    for k in WINDOW_SIZES:
        w = jax.random.normal(next(keys), (F, E, k), jnp.float32) * 0.05  # Conv1d (F,E,k)
        cb = jax.random.normal(next(keys), (F,), jnp.float32) * 0.05
        gamma = 1.0 + 0.1 * jax.random.normal(next(keys), (F,), jnp.float32)
        beta = 0.1 * jax.random.normal(next(keys), (F,), jnp.float32)
        mean = 0.05 * jax.random.normal(next(keys), (F,), jnp.float32)
        var = jnp.abs(1.0 + 0.1 * jax.random.normal(next(keys), (F,), jnp.float32))
        conv_params.append((w, cb, gamma, beta, mean, var))
    fc_w = jax.random.normal(next(keys), (F * len(WINDOW_SIZES), C), jnp.float32) * 0.05
    fc_b = jax.random.normal(next(keys), (1, C), jnp.float32) * 0.05

    # ---- host-side packing: fold BN scale into weights, build lane-dense slabs ----
    w_all = np.zeros((E, NLANE), np.float32)          # (E, 128) fused conv weights
    bias_slab = np.zeros((1, NLANE), np.float32)      # folded conv-bias + BN shift
    tmask = np.zeros((B * L, NLANE), np.float32)      # time-validity mask per lane block
    fcw_pad = np.zeros((NLANE, NLANE), np.float32)
    fcb_pad = np.zeros((1, NLANE), np.float32)
    fc_w_np, fc_b_np = np.asarray(fc_w), np.asarray(fc_b)
    for idx, k in enumerate(WINDOW_SIZES):
        w, cb, gamma, beta, mean, var = [np.asarray(a) for a in conv_params[idx]]
        scale = gamma / np.sqrt(var + BN_EPS)
        shift = beta - mean * scale
        off = OFFSETS[idx]
        for j in range(k):
            w_all[:, off + j * F: off + (j + 1) * F] = w[:, :, j].T * scale[None, :]
        bias_slab[0, off: off + F] = scale * cb + shift
        T = L - k + 1
        for b in range(B):
            tmask[b * L: b * L + T, off: off + k * F] = 1.0
        fcw_pad[off: off + F, :C] = fc_w_np[idx * F: (idx + 1) * F, :]
    fcb_pad[0, :C] = fc_b_np[0]

    emb_pad = np.zeros((VOCAB_PAD, E), np.float32)
    emb_pad[:VOCAB] = np.asarray(emb_table)
    ids2d = np.asarray(x_ids).reshape(B * L, 1).astype(np.int32)

    args = (jnp.asarray(ids2d), jnp.asarray(emb_pad), jnp.asarray(w_all),
            jnp.asarray(bias_slab), jnp.asarray(tmask),
            jnp.asarray(fcw_pad), jnp.asarray(fcb_pad))

    out = jax.jit(toxic_forward)(*args)
    out = jax.block_until_ready(out)

    ref = reference_forward(x_ids, emb_table, conv_params, fc_w, fc_b)
    assert out.shape == (B, C)
    assert jnp.allclose(out, ref, rtol=1e-4, atol=1e-4), "mismatch vs JAX reference"

    print("KERNEL_OK")
</pallas_src>

<mosaic_0001>
module attributes {stable_mosaic.version = 11 : i64} {
  func.func @toxic_kernel(%arg0: memref<32x1xi32, #tpu.memory_space<vmem>>, %arg1: memref<128x32xf32, #tpu.memory_space<vmem>>, %arg2: memref<32x128xf32, #tpu.memory_space<vmem>>, %arg3: memref<1x128xf32, #tpu.memory_space<vmem>>, %arg4: memref<32x128xf32, #tpu.memory_space<vmem>>, %arg5: memref<128x128xf32, #tpu.memory_space<vmem>>, %arg6: memref<1x128xf32, #tpu.memory_space<vmem>>, %arg7: memref<2x128xf32, #tpu.memory_space<vmem>>) attributes {dimension_semantics = [], scalar_prefetch = 0 : i64, scratch_operands = 0 : i64, tpu.core_type = #tpu.core_type<tc>} {
    %c0 = arith.constant 0 : index
    %c0_0 = arith.constant 0 : index
    %0 = vector.load %arg0[%c0, %c0_0] : memref<32x1xi32, #tpu.memory_space<vmem>>, vector<32x1xi32>
    %1 = tpu.iota {dimensions = array<i32: 1>} : vector<32x128xi32>
    %2 = vector.broadcast %0 : vector<32x1xi32> to vector<32x128xi32>
    %3 = arith.cmpi eq, %1, %2 : vector<32x128xi32>
    %4 = arith.extui %3 : vector<32x128xi1> to vector<32x128xi32>
    %5 = arith.sitofp %4 : vector<32x128xi32> to vector<32x128xf32>
    %c0_1 = arith.constant 0 : index
    %c0_2 = arith.constant 0 : index
    %6 = vector.load %arg1[%c0_1, %c0_2] : memref<128x32xf32, #tpu.memory_space<vmem>>, vector<128x32xf32>
    %cst = arith.constant dense<0.000000e+00> : vector<32x32xf32>
    %7 = tpu.matmul %5, %6, %cst {dimension_numbers = #tpu.dot_dimension_numbers<[1], [0], [0], [1], [0, 0, 1, 1], [], []>} : vector<32x128xf32>, vector<128x32xf32>, vector<32x32xf32> -> vector<32x32xf32>
    %c0_3 = arith.constant 0 : index
    %c0_4 = arith.constant 0 : index
    %8 = vector.load %arg2[%c0_3, %c0_4] : memref<32x128xf32, #tpu.memory_space<vmem>>, vector<32x128xf32>
    %cst_5 = arith.constant dense<0.000000e+00> : vector<32x128xf32>
    %9 = tpu.matmul %7, %8, %cst_5 {dimension_numbers = #tpu.dot_dimension_numbers<[1], [0], [0], [1], [0, 0, 1, 1], [], []>} : vector<32x32xf32>, vector<32x128xf32>, vector<32x128xf32> -> vector<32x128xf32>
    %10 = tpu.iota {dimensions = array<i32: 1>} : vector<1x128xi32>
    %11 = vector.extract_strided_slice %9 {offsets = [1, 0], sizes = [31, 128], strides = [1, 1]} : vector<32x128xf32> to vector<31x128xf32>
    %cst_6 = arith.constant 0.000000e+00 : f32
    %12 = vector.broadcast %cst_6 : f32 to vector<1x128xf32>
    %13 = tpu.concatenate %11, %12 in 0 : vector<31x128xf32>, vector<1x128xf32> -> vector<32x128xf32>
    %14 = vector.extract_strided_slice %13 {offsets = [0, 8], sizes = [32, 120], strides = [1, 1]} : vector<32x128xf32> to vector<32x120xf32>
    %cst_7 = arith.constant 0.000000e+00 : f32
    %15 = vector.broadcast %cst_7 : f32 to vector<32x8xf32>
    %16 = tpu.concatenate %14, %15 in 1 : vector<32x120xf32>, vector<32x8xf32> -> vector<32x128xf32>
    %c8_i32 = arith.constant 8 : i32
    %17 = vector.broadcast %c8_i32 : i32 to vector<1x128xi32>
    %18 = arith.cmpi sge, %10, %17 : vector<1x128xi32>
    %19 = arith.extui %18 : vector<1x128xi1> to vector<1x128xi32>
    %20 = arith.sitofp %19 : vector<1x128xi32> to vector<1x128xf32>
    %21 = vector.broadcast %20 : vector<1x128xf32> to vector<32x128xf32>
    %22 = arith.mulf %16, %21 : vector<32x128xf32>
    %23 = arith.addf %9, %22 : vector<32x128xf32>
    %24 = vector.extract_strided_slice %9 {offsets = [2, 0], sizes = [30, 128], strides = [1, 1]} : vector<32x128xf32> to vector<30x128xf32>
    %cst_8 = arith.constant 0.000000e+00 : f32
    %25 = vector.broadcast %cst_8 : f32 to vector<2x128xf32>
    %26 = tpu.concatenate %24, %25 in 0 : vector<30x128xf32>, vector<2x128xf32> -> vector<32x128xf32>
    %27 = vector.extract_strided_slice %26 {offsets = [0, 16], sizes = [32, 112], strides = [1, 1]} : vector<32x128xf32> to vector<32x112xf32>
    %cst_9 = arith.constant 0.000000e+00 : f32
    %28 = vector.broadcast %cst_9 : f32 to vector<32x16xf32>
    %29 = tpu.concatenate %27, %28 in 1 : vector<32x112xf32>, vector<32x16xf32> -> vector<32x128xf32>
    %c24_i32 = arith.constant 24 : i32
    %30 = vector.broadcast %c24_i32 : i32 to vector<1x128xi32>
    %31 = arith.cmpi sge, %10, %30 : vector<1x128xi32>
    %32 = arith.extui %31 : vector<1x128xi1> to vector<1x128xi32>
    %33 = arith.sitofp %32 : vector<1x128xi32> to vector<1x128xf32>
    %34 = vector.broadcast %33 : vector<1x128xf32> to vector<32x128xf32>
    %35 = arith.mulf %29, %34 : vector<32x128xf32>
    %36 = arith.addf %23, %35 : vector<32x128xf32>
    %37 = vector.extract_strided_slice %9 {offsets = [3, 0], sizes = [29, 128], strides = [1, 1]} : vector<32x128xf32> to vector<29x128xf32>
    %cst_10 = arith.constant 0.000000e+00 : f32
    %38 = vector.broadcast %cst_10 : f32 to vector<3x128xf32>
    %39 = tpu.concatenate %37, %38 in 0 : vector<29x128xf32>, vector<3x128xf32> -> vector<32x128xf32>
    %40 = vector.extract_strided_slice %39 {offsets = [0, 24], sizes = [32, 104], strides = [1, 1]} : vector<32x128xf32> to vector<32x104xf32>
    %cst_11 = arith.constant 0.000000e+00 : f32
    %41 = vector.broadcast %cst_11 : f32 to vector<32x24xf32>
    %42 = tpu.concatenate %40, %41 in 1 : vector<32x104xf32>, vector<32x24xf32> -> vector<32x128xf32>
    %c48_i32 = arith.constant 48 : i32
    %43 = vector.broadcast %c48_i32 : i32 to vector<1x128xi32>
    %44 = arith.cmpi sge, %10, %43 : vector<1x128xi32>
    %45 = arith.extui %44 : vector<1x128xi1> to vector<1x128xi32>
    %46 = arith.sitofp %45 : vector<1x128xi32> to vector<1x128xf32>
    %47 = vector.broadcast %46 : vector<1x128xf32> to vector<32x128xf32>
    %48 = arith.mulf %42, %47 : vector<32x128xf32>
    %49 = arith.addf %36, %48 : vector<32x128xf32>
    %50 = vector.extract_strided_slice %9 {offsets = [4, 0], sizes = [28, 128], strides = [1, 1]} : vector<32x128xf32> to vector<28x128xf32>
    %cst_12 = arith.constant 0.000000e+00 : f32
    %51 = vector.broadcast %cst_12 : f32 to vector<4x128xf32>
    %52 = tpu.concatenate %50, %51 in 0 : vector<28x128xf32>, vector<4x128xf32> -> vector<32x128xf32>
    %53 = vector.extract_strided_slice %52 {offsets = [0, 32], sizes = [32, 96], strides = [1, 1]} : vector<32x128xf32> to vector<32x96xf32>
    %cst_13 = arith.constant 0.000000e+00 : f32
    %54 = vector.broadcast %cst_13 : f32 to vector<32x32xf32>
    %55 = tpu.concatenate %53, %54 in 1 : vector<32x96xf32>, vector<32x32xf32> -> vector<32x128xf32>
    %c80_i32 = arith.constant 80 : i32
    %56 = vector.broadcast %c80_i32 : i32 to vector<1x128xi32>
    %57 = arith.cmpi sge, %10, %56 : vector<1x128xi32>
    %58 = arith.extui %57 : vector<1x128xi1> to vector<1x128xi32>
    %59 = arith.sitofp %58 : vector<1x128xi32> to vector<1x128xf32>
    %60 = vector.broadcast %59 : vector<1x128xf32> to vector<32x128xf32>
    %61 = arith.mulf %55, %60 : vector<32x128xf32>
    %62 = arith.addf %49, %61 : vector<32x128xf32>
    %c0_14 = arith.constant 0 : index
    %c0_15 = arith.constant 0 : index
    %63 = vector.load %arg3[%c0_14, %c0_15] : memref<1x128xf32, #tpu.memory_space<vmem>>, vector<1x128xf32>
    %64 = vector.broadcast %63 : vector<1x128xf32> to vector<32x128xf32>
    %65 = arith.addf %62, %64 : vector<32x128xf32>
    %cst_16 = arith.constant 0.000000e+00 : f32
    %66 = vector.broadcast %cst_16 : f32 to vector<32x128xf32>
    %67 = arith.maximumf %65, %66 : vector<32x128xf32>
    %c0_17 = arith.constant 0 : index
    %c0_18 = arith.constant 0 : index
    %68 = vector.load %arg4[%c0_17, %c0_18] : memref<32x128xf32, #tpu.memory_space<vmem>>, vector<32x128xf32>
    %69 = arith.mulf %67, %68 : vector<32x128xf32>
    %70 = vector.shape_cast %69 : vector<32x128xf32> to vector<2x16x128xf32>
    %cst_19 = arith.constant dense<0xFF800000> : vector<2x128xf32>
    %71 = vector.multi_reduction <maximumf>, %70, %cst_19 [1] : vector<2x16x128xf32> to vector<2x128xf32>
    %c0_20 = arith.constant 0 : index
    %c0_21 = arith.constant 0 : index
    %72 = vector.load %arg5[%c0_20, %c0_21] : memref<128x128xf32, #tpu.memory_space<vmem>>, vector<128x128xf32>
    %cst_22 = arith.constant dense<0.000000e+00> : vector<2x128xf32>
    %73 = tpu.matmul %71, %72, %cst_22 {dimension_numbers = #tpu.dot_dimension_numbers<[1], [0], [0], [1], [0, 0, 1, 1], [], []>} : vector<2x128xf32>, vector<128x128xf32>, vector<2x128xf32> -> vector<2x128xf32>
    %c0_23 = arith.constant 0 : index
    %c0_24 = arith.constant 0 : index
    %74 = vector.load %arg6[%c0_23, %c0_24] : memref<1x128xf32, #tpu.memory_space<vmem>>, vector<1x128xf32>
    %75 = vector.broadcast %74 : vector<1x128xf32> to vector<2x128xf32>
    %76 = arith.addf %73, %75 : vector<2x128xf32>
    %c0_25 = arith.constant 0 : index
    %c0_26 = arith.constant 0 : index
    %77 = vector.load %arg7[%c0_25, %c0_26] : memref<2x128xf32, #tpu.memory_space<vmem>>, vector<2x128xf32>
    tpu.vector_store %arg7[%c0_25, %c0_26], %76 {strides = array<i32>} : memref<2x128xf32, #tpu.memory_space<vmem>>, vector<2x128xf32>,
    return
  }
}

</mosaic_0001>

<bundles_post_ra>
// kernel: toxic_forward.1
= control target key start
LH: loop header
LB: loop body
LE: loop exit
PB: predicated region body
PF: predicated region fallthrough
CT: control target
= control target key end

     0   :  { %v820_v2 = vmov 0   ;;  %s1106_s0 = inlined_call_operand.vmem [shape: s32[32,1], index: 0, kind: input, shape index: {}]   ;;  %s1107_s1 = inlined_call_operand.vmem [shape: f32[128,32], index: 1, kind: input, shape index: {}]   ;;  %s1108_s2 = inlined_call_operand.vmem [shape: f32[32,128], index: 2, kind: input, shape index: {}]   ;;  %s1109_s3 = inlined_call_operand.vmem [shape: f32[1,128], index: 3, kind: input, shape index: {}]   ;;  %s1110_s4 = inlined_call_operand.vmem [shape: f32[32,128], index: 4, kind: input, shape index: {}]   ;;  %s1111_s5 = inlined_call_operand.vmem [shape: f32[128,128], index: 5, kind: input, shape index: {}]   ;;  %s1112_s6 = inlined_call_operand.vmem [shape: f32[1,128], index: 6, kind: input, shape index: {}]   ;;  %s1113_s7 = inlined_call_operand.hbm [shape: f32[2,128], index: 7, kind: output, shape index: {}]  }
   0x1   :  { %v29_v0 = vld [vmem:[%s1106_s0 + $0x10] sm:$0xff]  ;;  %v27_v1 = vld [vmem:[%s1106_s0] sm:$0xff]  ;;  %795 = vset.pattern.permute.xlu1 %v820_v2  ;;  %794 = vset.pattern.permute.xlu0 %v820_v2  ;;  %v58_v4 = vld [vmem:[%s1107_s1 + $0x8] sm:$0xff] }
   0x2   :  { %v57_v3 = vld [vmem:[%s1107_s1] sm:$0xff]  ;;  %40 = vperm.xlu1 %795, %v29_v0   ;;  %34 = vperm.xlu0 %794, %v27_v1   ;;  %v30_v5 = vld [vmem:[%s1106_s0 + $0x18] sm:$0xff]  ;;  %v59_v7 = vld [vmem:[%s1107_s1 + $0x10] sm:$0xff] }
   0x3   :  { %v720_v6 = vpack.c.bf16 %v58_v4, %v57_v3  ;;  %v60_v8 = vld [vmem:[%s1107_s1 + $0x18] sm:$0xff]  ;;  %v28_v9 = vld [vmem:[%s1106_s0 + $0x8] sm:$0xff]  ;;  %v61_v11 = vld [vmem:[%s1107_s1 + $0x20] sm:$0xff] }
   0x4   :  { %v724_v10 = vpack.c.bf16 %v60_v8, %v59_v7  ;;  %v62_v12 = vld [vmem:[%s1107_s1 + $0x28] sm:$0xff] }
   0x5   :  { %721 = vmatprep.subr.bf16.mxu0 %v720_v6  ;;  %v728_v13 = vpack.c.bf16 %v62_v12, %v61_v11 }
   0x6   :  { %723 = vmatpush3.bf16.msra.mxu0 %v720_v6  ;;  %43 = vperm.xlu1 %795, %v30_v5  }
   0x7   :  { %37 = vperm.xlu0 %794, %v28_v9  }
   0x8   :  { %12 = vsyncpa [#allocation3], 0  ;;  %725 = vmatprep.subr.bf16.mxu0 %v724_v10  ;;  %v63_v14 = vld [vmem:[%s1107_s1 + $0x30] sm:$0xff]  ;;  %v64_v15 = vld [vmem:[%s1107_s1 + $0x38] sm:$0xff]  ;;  %v31_v35 = vlaneseq  ;;  %v821_v39 = vmov 1.0   ;;  %vm162_vm4 = vcmask 261120  }
   0x9   :  { %v732_v16 = vpack.c.bf16 %v64_v15, %v63_v14  ;;  %v65_v17 = vld [vmem:[%s1107_s1 + $0x40] sm:$0xff]  ;;  %v66_v18 = vld [vmem:[%s1107_s1 + $0x48] sm:$0xff]  ;;  %v160_v21 = vld [vmem:[%s1108_s2 + $0x10] sm:$0xff]  ;;  %vm264_vm5 = vcmask 1046528   ;;  %vm303_vm6 = vcmask 1045504   ;;  %vm342_vm7 = vcmask 1044480  }
   0xa   :  { %727 = vmatpush3.bf16.msra.mxu0 %v724_v10  ;;  %v158_v19 = vld [vmem:[%s1108_s2] sm:$0xff]  ;;  %v159_v20 = vld [vmem:[%s1108_s2 + $0x8] sm:$0xff]  ;;  %v161_v23 = vld [vmem:[%s1108_s2 + $0x18] sm:$0xff]  ;;  %v736_v25 = vpack.c.bf16 %v66_v18, %v65_v17  ;;  %v942_v36 = vand.u32 127, %v31_v35  ;;  %vm381_vm8 = vcmask 1043456   ;;  %s823_s23 = smov 112  }
   0xb   :  { %729 = vmatprep.subr.bf16.mxu0 %v728_v13  ;;  %v752_v22 = vpack.c.bf16 %v159_v20, %v158_v19  ;;  %v756_v24 = vpack.c.bf16 %v161_v23, %v160_v21  ;;  %v67_v26 = vld [vmem:[%s1107_s1 + $0x50] sm:$0xff]  ;;  %v68_v27 = vld [vmem:[%s1107_s1 + $0x58] sm:$0xff]  ;;  %v69_v29 = vld [vmem:[%s1107_s1 + $0x60] sm:$0xff]  ;;  %s824_s24 = smov 104   ;;  %s825_s29 = smov 96   ;;  %v826_v20 = vmov 0.0|0.0  }
   0xc   :  { %v740_v28 = vpack.c.bf16 %v68_v27, %v67_v26  ;;  %v70_v30 = vld [vmem:[%s1107_s1 + $0x68] sm:$0xff]  ;;  %v71_v32 = vld [vmem:[%s1107_s1 + $0x70] sm:$0xff]  ;;  %v72_v33 = vld [vmem:[%s1107_s1 + $0x78] sm:$0xff]  ;;  %s822_s1 = smov 120   ;;  %vm827_vm9 = vmmov 0   ;;  %vm287_vm10 = vcmask 982016  }
   0xd   :  { %753 = vmatprep.subr.bf16.mxu1 %v752_v22  ;;  %v744_v31 = vpack.c.bf16 %v70_v30, %v69_v29  ;;  %v748_v34 = vpack.c.bf16 %v72_v33, %v71_v32  ;;  %v457_v17 = vld [vmem:[%s1111_s5] sm:$0xff]  ;;  %v458_v18 = vld [vmem:[%s1111_s5 + $0x8] sm:$0xff]  ;;  %v459_v21 = vld [vmem:[%s1111_s5 + $0x10] sm:$0xff]  ;;  %vm292_vm11 = vcmp.ge.s32.totalorder %v942_v36, 8  ;;  %vm326_vm12 = vcmask 916480   ;;  %s829_s2 = smov [#allocation2]  }
   0xe   :  { %731 = vmatpush3.bf16.msra.mxu0 %v728_v13  ;;  %755 = vmatpush3.bf16.msra.mxu1 %v752_v22  ;;  %v761_v19 = vpack.c.bf16 %v458_v18, %v457_v17  ;;  %v460_v22 = vld [vmem:[%s1111_s5 + $0x18] sm:$0xff]  ;;  %v463_v27 = vld [vmem:[%s1111_s5 + $0x30] sm:$0xff]  ;;  %v465_v30 = vld [vmem:[%s1111_s5 + $0x40] sm:$0xff]  ;;  %vm331_vm13 = vcmp.ge.s32.totalorder %v942_v36, 24  ;;  %vm365_vm14 = vcmask 850944   ;;  %vm370_vm15 = vcmp.ge.s32.totalorder %v942_v36, 48 }
   0xf   :  { %733 = vmatprep.subr.bf16.mxu0 %v732_v16  ;;  %757 = vmatprep.subr.bf16.mxu1 %v756_v24  ;;  %v764_v23 = vpack.c.bf16 %v460_v22, %v459_v21  ;;  %v468_v35 = vld [vmem:[%s1111_s5 + $0x58] sm:$0xff]  ;;  %s562_s18 = sshll.u32 %s829_s2, 4  ;;  %s563_s18 = int_to_ptr.vmem [resolvable:$true] %s562_s18 }
  0x10   :  { %s796_s19 = scalar_lea.vmem %s563_s18, 32  ;;  %p801_p1 = scmp.lt.s32.totalorder %s563_s18, %s563_s18 }
  0x11   :  { %p797_p0 = scmp.ne.s32.totalorder %s563_s18, %s796_s19  ;;  %p802_p2 = scmp.lt.s32.totalorder %s796_s19, %s796_s19 }
  0x12   :  { %735 = vmatpush3.bf16.msra.mxu0 %v732_v16  ;;  %759 = vmatpush3.bf16.msra.mxu1 %v756_v24  ;;  %v461_v24 = vld [vmem:[%s1111_s5 + $0x20] sm:$0xff] }
  0x13   :  { %737 = vmatprep.subr.bf16.mxu0 %v736_v25  ;;  %760 = vmatprep.subr.bf16.mxu1 %v826_v20  ;;  %p803_p3 = por %p802_p2, %p801_p1 }
  0x15   :  { %p804_p4 = pnand %p803_p3, %p797_p0 }
  0x16   :  { %739 = vmatpush3.bf16.msra.mxu0 %v736_v25  ;;  %v462_v25 = vld [vmem:[%s1111_s5 + $0x28] sm:$0xff] }
  0x17   :  { %741 = vmatprep.subr.bf16.mxu0 %v740_v28  ;;  %v767_v26 = vpack.c.bf16 %v462_v25, %v461_v24 }
  0x1a   :  { %743 = vmatpush3.bf16.msra.mxu0 %v740_v28  ;;  %v464_v28 = vld [vmem:[%s1111_s5 + $0x38] sm:$0xff] }
  0x1b   :  { %745 = vmatprep.subr.bf16.mxu0 %v744_v31  ;;  %v770_v29 = vpack.c.bf16 %v464_v28, %v463_v27  ;;  %v586_v28 = vld [vmem:[%s1109_s3] ss:$0 sm:$0xff] }
  0x1e   :  { %747 = vmatpush3.bf16.msra.mxu0 %v744_v31  ;;  %v466_v31 = vld [vmem:[%s1111_s5 + $0x48] sm:$0xff] }
  0x1f   :  { %749 = vmatprep.subr.bf16.mxu0 %v748_v34  ;;  %v773_v32 = vpack.c.bf16 %v466_v31, %v465_v30 }
  0x22   :  { %751 = vmatpush3.bf16.msra.mxu0 %v748_v34  ;;  %v467_v34 = vld [vmem:[%s1111_s5 + $0x50] sm:$0xff] }
  0x81   :  { %v41_v37 = vpop.permute.xlu1 %40  ;;  %v35_v38 = vpop.permute.xlu0 %34 }
  0x82   :  { %vm45_vm0 = vcmp.eq.s32.totalorder %v942_v36, %v35_v38  ;;  %vm47_vm1 = vcmp.eq.s32.totalorder %v942_v36, %v41_v37  ;;  %v776_v37 = vpack.c.bf16 %v468_v35, %v467_v34  ;;  %v469_v38 = vld [vmem:[%s1111_s5 + $0x60] sm:$0xff] }
  0x83   :  { %665 = vmatprep.mubr.msk.f32.mxu0 %vm45_vm0, %v821_v39  ;;  %vm404_vm0 = vcmask 785408  }
  0x85   :  { %v44_v41 = vpop.permute.xlu1 %43 }
  0x86   :  { %v38_v40 = vpop.permute.xlu0 %37  ;;  %vm48_vm3 = vcmp.eq.s32.totalorder %v942_v36, %v44_v41 }
  0x87   :  { %vm46_vm2 = vcmp.eq.s32.totalorder %v942_v36, %v38_v40  ;;  %v471_v40 = vld [vmem:[%s1111_s5 + $0x70] sm:$0xff] }
  0x88   :  { %666 = vmatmul.mubr.msk.f32.vlgmr.msra.gmra.mrb[0].mxu0 %vm46_vm2, %v821_v39  ;;  %vm482_vm2 = vcmask 1041409  }
  0x89   :  { %668 = vmatprep.mubr.msk.f32.mxu0 %vm47_vm1, %v821_v39  ;;  %vm409_vm1 = vcmp.ge.s32.totalorder %v942_v36, 80 }
  0x8c   :  { %669 = vmatmul.mubr.msk.f32.gmra.mrb[2].mxu0 %vm48_vm3, %v821_v39  ;;  %v470_v39 = vld [vmem:[%s1111_s5 + $0x68] sm:$0xff] }
  0x8d   :  { %v779_v41 = vpack.c.bf16 %v470_v39, %v469_v38 }
 0x15b   :  { %v667_v42 = vpop.f32.mrb[0].mxu0 }
 0x15c   :  { %v139_v43 = vpop.f32.mrb[1].mxu0 }
 0x15d   :  { %679 = vmatprep.mubr.msk.f32.mxu1 %vm162_vm4, %v139_v43  ;;  %v828_v43 = vmov 0.0  }
 0x15e   :  { %680 = vmatmul.mubr.msk.f32.vlgmr.msra.gmra.mrb[0].mxu1 %vm162_vm4, %v667_v42  ;;  %v472_v42 = vld [vmem:[%s1111_s5 + $0x78] sm:$0xff] }
 0x15f   :  { %v670_v44 = vpop.f32.mrb[2].mxu0  ;;  %762 = vmatpush3.bf16.msra.mxu1 %v761_v19 }
 0x160   :  { %v149_v45 = vpop.f32.mrb[3].mxu0  ;;  %763 = vmatprep.subr.bf16.mxu1 %v826_v20 }
 0x161   :  { %682 = vmatprep.mubr.msk.f32.mxu1 %vm162_vm4, %v149_v45 }
 0x162   :  { %683 = vmatmul.mubr.msk.f32.gmra.mrb[2].mxu1 %vm162_vm4, %v670_v44  ;;  %v782_v44 = vpack.c.bf16 %v472_v42, %v471_v40 }
 0x163   :  { %765 = vmatpush3.bf16.msra.mxu1 %v764_v23  ;;  %717 = vmatprep.mubr.msk.f32.mxu1 %vm827_vm9, %v828_v43 }
 0x164   :  { %766 = vmatprep.subr.bf16.mxu1 %v826_v20 }
 0x167   :  { %768 = vmatpush3.bf16.msra.mxu1 %v767_v26 }
 0x168   :  { %769 = vmatprep.subr.bf16.mxu1 %v826_v20 }
 0x16b   :  { %771 = vmatpush3.bf16.msra.mxu1 %v770_v29 }
 0x16c   :  { %772 = vmatprep.subr.bf16.mxu1 %v826_v20 }
 0x16f   :  { %774 = vmatpush3.bf16.msra.mxu1 %v773_v32 }
 0x170   :  { %775 = vmatprep.subr.bf16.mxu1 %v826_v20 }
 0x173   :  { %777 = vmatpush3.bf16.msra.mxu1 %v776_v37 }
 0x174   :  { %778 = vmatprep.subr.bf16.mxu1 %v826_v20 }
 0x177   :  { %780 = vmatpush3.bf16.msra.mxu1 %v779_v41 }
 0x178   :  { %781 = vmatprep.subr.bf16.mxu1 %v826_v20 }
 0x17b   :  { %783 = vmatpush3.bf16.msra.mxu1 %v782_v44 }
 0x231   :  { %v948_v46 = vpop.f32.mrb[0].mxu1 }
 0x232   :  { %v950_v47 = vpop.f32.mrb[1].mxu1  ;;  %v266_v48 = vrot.slane %v948_v46, 1  ;;  %v305_v49 = vrot.slane %v948_v46, 2  ;;  %v344_v50 = vrot.slane %v948_v46, 3  ;;  %v383_v51 = vrot.slane %v948_v46, 4 }
 0x233   :  { %v265_v52 = vrot.slane %v950_v47, 1  ;;  %v304_v53 = vrot.slane %v950_v47, 2  ;;  %v343_v54 = vrot.slane %v950_v47, 3  ;;  %v382_v55 = vrot.slane %v950_v47, 4 }
 0x235   :  { %v960_v56 = vpop.f32.mrb[2].mxu1  ;;  %v267_v57 = vsel %vm264_vm5, %v265_v52, %v266_v48  ;;  %v306_v58 = vsel %vm303_vm6, %v304_v53, %v305_v49  ;;  %v345_v59 = vsel %vm342_vm7, %v343_v54, %v344_v50  ;;  %v384_v60 = vsel %vm381_vm8, %v382_v55, %v383_v51 }
 0x236   :  { %275 = vrot.lane.b32.xlu0 %v267_v57, %s822_s1  ;;  %v967_v61 = vpop.f32.mrb[3].mxu1  ;;  %v270_v62 = vrot.slane %v960_v56, 1  ;;  %v309_v63 = vrot.slane %v960_v56, 2  ;;  %v348_v0 = vrot.slane %v960_v56, 3  ;;  %v387_v1 = vrot.slane %v960_v56, 4 }
 0x237   :  { %v268_v2 = vrot.slane %v967_v61, 1  ;;  %v307_v3 = vrot.slane %v967_v61, 2  ;;  %v346_v4 = vrot.slane %v967_v61, 3  ;;  %v385_v5 = vrot.slane %v967_v61, 4 }
 0x238   :  { %v273_v6 = vsel %vm264_vm5, %v270_v62, 0.0  ;;  %v312_v15 = vsel %vm303_vm6, %v309_v63, 0.0  ;;  %v351_v16 = vsel %vm342_vm7, %v348_v0, 0.0  ;;  %v390_v33 = vsel %vm381_vm8, %v387_v1, 0.0 }
 0x239   :  { %281 = vrot.lane.b32.xlu1 %v273_v6, %s822_s1  ;;  %v269_v7 = vsel %vm264_vm5, %v266_v48, %v268_v2  ;;  %v271_v8 = vsel %vm264_vm5, %v268_v2, %v270_v62  ;;  %v308_v9 = vsel %vm303_vm6, %v305_v49, %v307_v3  ;;  %v310_v10 = vsel %vm303_vm6, %v307_v3, %v309_v63 }
 0x23a   :  { %314 = vrot.lane.b32.xlu0 %v306_v58, %s823_s23  ;;  %v347_v11 = vsel %vm342_vm7, %v344_v50, %v346_v4  ;;  %v349_v12 = vsel %vm342_vm7, %v346_v4, %v348_v0  ;;  %v386_v13 = vsel %vm381_vm8, %v383_v51, %v385_v5  ;;  %v388_v14 = vsel %vm381_vm8, %v385_v5, %v387_v1 }
 0x23b   :  { %v582_v53 = vsel %vm292_vm11, 1.0, %v828_v43  ;;  %v583_v57 = vsel %vm331_vm13, 1.0, %v828_v43  ;;  %v584_v62 = vsel %vm370_vm15, 1.0, %v828_v43  ;;  %v585_v2 = vsel %vm409_vm1, 1.0, %v828_v43 }
 0x23d   :  { %320 = vrot.lane.b32.xlu1 %v312_v15, %s823_s23 }
 0x23e   :  { %353 = vrot.lane.b32.xlu0 %v345_v59, %s824_s24 }
 0x241   :  { %359 = vrot.lane.b32.xlu1 %v351_v16, %s824_s24 }
 0x242   :  { %392 = vrot.lane.b32.xlu0 %v384_v60, %s825_s29 }
 0x245   :  { %277 = vrot.lane.b32.xlu1 %v269_v7, %s822_s1 }
 0x246   :  { %279 = vrot.lane.b32.xlu0 %v271_v8, %s822_s1 }
 0x249   :  { %316 = vrot.lane.b32.xlu1 %v308_v9, %s823_s23 }
 0x24a   :  { %318 = vrot.lane.b32.xlu0 %v310_v10, %s823_s23 }
 0x24d   :  { %355 = vrot.lane.b32.xlu1 %v347_v11, %s824_s24 }
 0x24e   :  { %357 = vrot.lane.b32.xlu0 %v349_v12, %s824_s24 }
 0x251   :  { %394 = vrot.lane.b32.xlu1 %v386_v13, %s825_s29 }
 0x252   :  { %396 = vrot.lane.b32.xlu0 %v388_v14, %s825_s29 }
 0x255   :  { %398 = vrot.lane.b32.xlu1 %v390_v33, %s825_s29 }
 0x2a8   :  { %v276_v45 = vpop.permute.xlu0 %275 }
 0x2a9   :  { %v288_v54 = vsel %vm287_vm10, %v276_v45, 0.0 }
 0x2aa   :  { %v295_v59 = vmul.f32 %v582_v53, %v288_v54  ;;  %v435_v54 = vld [vmem:[%s1110_s4] sm:$0xff] }
 0x2ab   :  { %v282_v48 = vpop.permute.xlu1 %281 }
 0x2ac   :  { %v315_v49 = vpop.permute.xlu0 %314  ;;  %v299_v5 = vadd.f32 %v295_v59, %v950_v47  ;;  %v291_v9 = vsel %vm287_vm10, %v282_v48, 0.0 }
 0x2ad   :  { %v327_v58 = vsel %vm326_vm12, %v315_v49, 0.0  ;;  %v298_v16 = vmul.f32 %v582_v53, %v291_v9 }
 0x2ae   :  { %v334_v1 = vmul.f32 %v583_v57, %v327_v58 }
 0x2af   :  { %v321_v50 = vpop.permute.xlu1 %320  ;;  %v302_v34 = vadd.f32 %v960_v56, %v298_v16 }
 0x2b0   :  { %v354_v51 = vpop.permute.xlu0 %353  ;;  %v338_v11 = vadd.f32 %v334_v1, %v299_v5  ;;  %v330_v47 = vsel %vm326_vm12, %v321_v50, 0.0  ;;  %v437_v1 = vld [vmem:[%s1110_s4 + $0x10] sm:$0xff] }
 0x2b1   :  { %v366_v63 = vsel %vm365_vm14, %v354_v51, 0.0  ;;  %v337_v31 = vmul.f32 %v583_v57, %v330_v47  ;;  %v587_v47 = vld [vmem:[%s1112_s6] ss:$0 sm:$0xff] }
 0x2b2   :  { %v373_v6 = vmul.f32 %v584_v62, %v366_v63 }
 0x2b3   :  { %v360_v52 = vpop.permute.xlu1 %359  ;;  %v341_v45 = vadd.f32 %v337_v31, %v302_v34 }
 0x2b4   :  { %v393_v55 = vpop.permute.xlu0 %392  ;;  %v377_v17 = vadd.f32 %v373_v6, %v338_v11  ;;  %v369_v20 = vsel %vm365_vm14, %v360_v52, 0.0 }
 0x2b5   :  { %v405_v3 = vsel %vm404_vm0, %v393_v55, 0.0  ;;  %v376_v35 = vmul.f32 %v584_v62, %v369_v20  ;;  %v436_v55 = vld [vmem:[%s1110_s4 + $0x8] sm:$0xff] }
 0x2b6   :  { %v412_v12 = vmul.f32 %v585_v2, %v405_v3 }
 0x2b7   :  { %v278_v60 = vpop.permute.xlu1 %277  ;;  %v380_v51 = vadd.f32 %v376_v35, %v341_v45 }
 0x2b8   :  { %v280_v0 = vpop.permute.xlu0 %279  ;;  %v289_v4 = vsel %vm287_vm10, %v278_v60, 0.0  ;;  %v416_v24 = vadd.f32 %v412_v12, %v377_v17 }
 0x2b9   :  { %v290_v7 = vsel %vm287_vm10, %v280_v0, 0.0  ;;  %v296_v13 = vmul.f32 %v582_v53, %v289_v4 }
 0x2ba   :  { %v297_v15 = vmul.f32 %v582_v53, %v290_v7  ;;  %v427_v39 = vadd.f32 %v586_v28, %v416_v24 }
 0x2bb   :  { %v317_v8 = vpop.permute.xlu1 %316  ;;  %v300_v25 = vadd.f32 %v948_v46, %v296_v13 }
 0x2bc   :  { %v328_v36 = vsel %vm326_vm12, %v317_v8, 0.0  ;;  %v319_v10 = vpop.permute.xlu0 %318  ;;  %v301_v29 = vadd.f32 %v297_v15, %v967_v61  ;;  %v431_v56 = vmax.f32 %v427_v39, 0.0 }
 0x2bd   :  { %v329_v14 = vsel %vm326_vm12, %v319_v10, 0.0  ;;  %v335_v18 = vmul.f32 %v583_v57, %v328_v36 }
 0x2be   :  { %v336_v21 = vmul.f32 %v583_v57, %v329_v14  ;;  %v439_v60 = vmul.f32 %v435_v54, %v431_v56 }
 0x2bf   :  { %v356_v19 = vpop.permute.xlu1 %355  ;;  %v339_v32 = vadd.f32 %v335_v18, %v300_v25 }
 0x2c0   :  { %v367_v22 = vsel %vm365_vm14, %v356_v19, 0.0  ;;  %v358_v23 = vpop.permute.xlu0 %357  ;;  %v340_v37 = vadd.f32 %v336_v21, %v301_v29 }
 0x2c1   :  { %v374_v26 = vmul.f32 %v584_v62, %v367_v22  ;;  %v368_v27 = vsel %vm365_vm14, %v358_v23, 0.0 }
 0x2c2   :  { %v375_v30 = vmul.f32 %v584_v62, %v368_v27 }
 0x2c3   :  { %v395_v33 = vpop.permute.xlu1 %394  ;;  %v378_v40 = vadd.f32 %v374_v26, %v339_v32 }
 0x2c4   :  { %v406_v38 = vsel %vm404_vm0, %v395_v33, 0.0  ;;  %v397_v46 = vpop.permute.xlu0 %396  ;;  %v379_v43 = vadd.f32 %v375_v30, %v340_v37 }
 0x2c5   :  { %v413_v41 = vmul.f32 %v585_v2, %v406_v38  ;;  %v407_v42 = vsel %vm404_vm0, %v397_v46, 0.0 }
 0x2c6   :  { %v414_v44 = vmul.f32 %v585_v2, %v407_v42 }
 0x2c7   :  { %v417_v61 = vadd.f32 %v413_v41, %v378_v40  ;;  %v399_v48 = vpop.permute.xlu1 %398 }
 0x2c8   :  { %v418_v49 = vadd.f32 %v414_v44, %v379_v43  ;;  %v408_v50 = vsel %vm404_vm0, %v399_v48, 0.0 }
 0x2c9   :  { %v428_v52 = vadd.f32 %v586_v28, %v417_v61  ;;  %v415_v53 = vmul.f32 %v585_v2, %v408_v50  ;;  %v438_v2 = vld [vmem:[%s1110_s4 + $0x18] sm:$0xff] }
 0x2ca   :  { %v429_v57 = vadd.f32 %v586_v28, %v418_v49 }
 0x2cb   :  { %v432_v58 = vmax.f32 %v428_v52, 0.0  ;;  %v419_v59 = vadd.f32 %v415_v53, %v380_v51 }
 0x2cc   :  { %v433_v63 = vmax.f32 %v429_v57, 0.0 }
 0x2cd   :  { %v440_v62 = vmul.f32 %v436_v55, %v432_v58  ;;  %v430_v0 = vadd.f32 %v586_v28, %v419_v59 }
 0x2ce   :  { %v441_v6 = vmul.f32 %v437_v1, %v433_v63 }
 0x2cf   :  { %v443_v3 = vmax.f32 %v439_v60, %v440_v62  ;;  %v434_v4 = vmax.f32 %v430_v0, 0.0 }
 0x2d1   :  { %v444_v5 = vrot.slane %v443_v3, 4  ;;  %v442_v7 = vmul.f32 %v438_v2, %v434_v4 }
 0x2d3   :  { %v445_v8 = vmax.f32 %v443_v3, %v444_v5  ;;  %v450_v9 = vmax.f32 %v441_v6, %v442_v7 }
 0x2d5   :  { %v446_v36 = vrot.slane %v445_v8, 2  ;;  %v451_v10 = vrot.slane %v450_v9, 4 }
 0x2d7   :  { %v452_v11 = vmax.f32 %v450_v9, %v451_v10  ;;  %v447_v12 = vmax.f32 %v445_v8, %v446_v36 }
 0x2d9   :  { %v453_v13 = vrot.slane %v452_v11, 2  ;;  %v448_v14 = vrot.slane %v447_v12, 1 }
 0x2db   :  { %v454_v15 = vmax.f32 %v452_v11, %v453_v13  ;;  %v449_v17 = vmax.f32 %v447_v12, %v448_v14 }
 0x2dd   :  { %v455_v16 = vrot.slane %v454_v15, 1 }
 0x2df   :  { %v456_v18 = vmax.f32 %v454_v15, %v455_v16 }
 0x2e1   :  { %v483_v19 = vsel %vm482_vm2, %v456_v18, %v449_v17 }
 0x2e2   :  { %718 = vmatmul.mubr.f32.vlgmr.msra.gmra.mrb[4].mxu1 %v483_v19 }
 0x3b5   :  { %v551_v20 = vpop.f32.mrb[4].mxu1 }
 0x3b6   :  { %v552_v21 = vadd.f32 %v587_v47, %v551_v20  ;;  %v719_v22 = vpop.f32.mrb[5].mxu1 }
 0x3b8   :  { %555 = vst [vmem:[#allocation2] sm:$0x3] %v552_v21 }
 0x3b9   :  { %807 = shalt.err (!%p804_p4)
}
 0x3ba   :  { %s808_s22 = scalar_lea.hbm %s1113_s7, 32 }
 0x3bb   :  { %p809_p5 = scmp.ne.s32.totalorder %s1113_s7, %s808_s22  ;;  %p812_p6 = scmp.lt.u32.totalorder %s808_s22, %s1113_s7 }
 0x3bd   :  { %p814_p7 = pnand %p812_p6, %p809_p5 }
 0x3bf   :  { %817 = shalt.err (!%p814_p7)
}
 0x3c0   :  { %565 = dma.vmem_to_hbm [thread:$0]  %s563_s18, 32, %s1113_s7, [#allocation3]  }
 0x3c1   :  { %818 = dma.done.wait [#allocation3], 32  }
 0x3c2   :  { %819 = vsyncadd [#allocation3], 4294967264 }
 0x3c3   :  { %569 = vsyncpa [#allocation3], 1 }

</bundles_post_ra>
